<compile_context>
chip_gen: v6e
topology: v6e:2x2x1
jax: 0.10.0
libtpu: 0.0.40
codegen_flags: <defaults>
</compile_context>

<pallas_src>
import jax
import jax.numpy as jnp
from jax.experimental import pallas as pl
from jax.experimental.pallas import tpu as pltpu


# ---------------------------------------------------------------------------
# Generation-aware sizing helpers
# ---------------------------------------------------------------------------
def _vmem_capacity_bytes():
    try:
        info = pltpu.get_tpu_info()
        return int(getattr(info, "vmem_capacity_bytes", 64 * 1024 * 1024))
    except Exception:
        return 64 * 1024 * 1024          # conservative (v7x-like) default


def _gen_params():
    big = _vmem_capacity_bytes() >= 100 * 1024 * 1024      # v5e / v6e (128 MiB)
    return dict(
        vmem_limit=(64 if big else 32) * 1024 * 1024,      # leave headroom on v7x
        ln_target_bytes=(8 if big else 3) * 1024 * 1024,   # streaming tile budget
        max_rows=2048 if big else 1024,                    # MLP row tile cap
    )


def _round_up(x, m):
    return -(-x // m) * m


def _pick_tile_hw(hw, bytes_per_col, batch, target_bytes):
    """Largest lane-dense (multiple of 128) h*w tile within the byte budget."""
    if hw < 256 or hw * bytes_per_col <= target_bytes:
        tile = hw
    else:
        t = (target_bytes // bytes_per_col) // 128 * 128
        tile = int(max(128, min(t, (hw // 128) * 128)))
    # Guarantee a >=2-step grid: v7x shards "parallel" axes over 2 TensorCores,
    # and >=2 steps also enables DMA/compute double-buffer overlap.
    if batch * pl.cdiv(hw, tile) < 2 and hw >= 256:
        tile = max(128, (hw // 2) // 128 * 128)
    return int(tile)


# ---------------------------------------------------------------------------
# Kernel A: channel LayerNorm (over C of NCHW) fused into TTSA's qkv 1x1 conv.
# Lane-dense: h*w on the 128-lane axis, channel reduction over sublanes.
# ---------------------------------------------------------------------------
def _chan_ln_qkv_kernel(x_ref, w_ref, b_ref, o_ref):
    x = x_ref[0].astype(jnp.float32)                       # (C, T)
    inv_c = 1.0 / x.shape[0]
    mu = jnp.sum(x, axis=0, keepdims=True) * inv_c         # (1, T)
    ex2 = jnp.sum(x * x, axis=0, keepdims=True) * inv_c    # (1, T)
    r = jax.lax.rsqrt(ex2 - mu * mu + 1e-5)                # EUP rsqrt (free slot)
    # gamma/beta are folded into w/b on the wrapper side; keep the MXU operands
    # in the weight dtype (native bf16 path when the model is bf16).
    y = ((x - mu) * r).astype(w_ref.dtype)                 # (C, T)
    qkv = jnp.dot(w_ref[...], y, preferred_element_type=jnp.float32)
    o_ref[0] = (qkv + b_ref[...]).astype(o_ref.dtype)      # (3C, T)


def channel_layernorm_qkv(x_nchw, gamma, beta, w_qkv, b_qkv):
    """LayerNorm over channels of NCHW fused with the 1x1-conv qkv projection.

    x_nchw : (b, c, h, w);  w_qkv : (3c, c);  b_qkv : (3c,)  ->  (b, 3c, h, w)
    """
    b, c, h, w = x_nchw.shape
    hw = h * w
    c_out = w_qkv.shape[0]
    x3 = x_nchw.reshape(b, c, hw)                 # free reshape, no HBM shuffle

    gp = _gen_params()

    # Fold LN affine params into the projection (fold in f32, keep weight dtype).
    gamma32 = gamma.astype(jnp.float32)
    beta32 = beta.astype(jnp.float32)
    w32 = w_qkv.astype(jnp.float32)
    w_eff = (w32 * gamma32[None, :]).astype(w_qkv.dtype)
    b_eff = (w32 @ beta32 + b_qkv.astype(jnp.float32)).reshape(c_out, 1)  # f32

    itemsize = x3.dtype.itemsize
    bytes_per_col = 2 * (c + c_out) * itemsize    # double-buffered in + out
    tile = _pick_tile_hw(hw, bytes_per_col, b, gp["ln_target_bytes"])
    grid = (b, pl.cdiv(hw, tile))

    out = pl.pallas_call(
        _chan_ln_qkv_kernel,
        out_shape=jax.ShapeDtypeStruct((b, c_out, hw), x3.dtype),
        grid=grid,
        in_specs=[
            pl.BlockSpec((1, c, tile), lambda bi, ti: (bi, 0, ti)),
            # TODO(synk): mark constant-index weight/bias blocks with
            # pipeline_mode=pl.Buffered(1) once verified on this jax version.
            pl.BlockSpec((c_out, c), lambda bi, ti: (0, 0)),
            pl.BlockSpec((c_out, 1), lambda bi, ti: (0, 0)),
        ],
        out_specs=pl.BlockSpec((1, c_out, tile), lambda bi, ti: (bi, 0, ti)),
        compiler_params=pltpu.CompilerParams(
            dimension_semantics=("parallel", "parallel"),
            vmem_limit_bytes=gp["vmem_limit"],
        ),
    )(x3, w_eff, b_eff)
    return out.reshape(b, c_out, h, w)


# ---------------------------------------------------------------------------
# Kernel B: fused LayerNorm + Mlp + residual (HAB's `x + mlp(norm2(x))`).
# ---------------------------------------------------------------------------
def _gelu_tanh(x):
    # TODO(synk): PyTorch nn.GELU() default is exact (erf) GELU; tanh approx is
    # used for guaranteed Mosaic lowering (max abs deviation ~1e-3). Switch to
    # an erf-based GELU if the single EUP slot becomes the binding unit.
    x2 = x * x
    return 0.5 * x * (1.0 + jnp.tanh(0.7978845608028654 * x * (1.0 + 0.044715 * x2)))


def _ln_mlp_residual_kernel(x_ref, w1_ref, b1_ref, w2_ref, b2_ref, o_ref):
    x = x_ref[...].astype(jnp.float32)                     # (TM, C) f32 stats
    inv_c = 1.0 / x.shape[-1]
    mu = jnp.sum(x, axis=-1, keepdims=True) * inv_c
    ex2 = jnp.sum(x * x, axis=-1, keepdims=True) * inv_c
    r = jax.lax.rsqrt(ex2 - mu * mu + 1e-5)
    # gamma/beta are folded into w1/b1 on the wrapper side; matmul operands stay
    # in the weight dtype (no f32 up-cast of the MXU inputs).
    y = ((x - mu) * r).astype(w1_ref.dtype)
    h = jnp.dot(y, w1_ref[...], preferred_element_type=jnp.float32) + b1_ref[...]
    g = _gelu_tanh(h).astype(w2_ref.dtype)
    z = jnp.dot(g, w2_ref[...], preferred_element_type=jnp.float32) + b2_ref[...]
    o_ref[...] = (x + z).astype(o_ref.dtype)


def fused_layernorm_mlp(x_tokens, gamma, beta, w1, b1, w2, b2, *, max_rows=None):
    """out = x + fc2(gelu(fc1(LayerNorm(x)))) for tokens (b, n, c).

    HAB's `x + drop_path(mlp(norm2(x)))` with drop_path / dropout = identity
    (eval mode).
    """
    b, n, c = x_tokens.shape
    hidden = w1.shape[1]
    rows = b * n
    x2 = x_tokens.reshape(rows, c)                # free reshape, no transpose

    gp = _gen_params()
    if max_rows is None:
        max_rows = gp["max_rows"]

    if rows <= max_rows:
        tm = rows
        if rows >= 16:
            # >= 2 grid steps so both v7x TCs get work and buffers can overlap.
            tm = _round_up(-(-rows // 2), 8)
    else:
        tm = max_rows
    grid = (pl.cdiv(rows, tm),)

    # Fold LN affine params into fc1 (fold in f32, preserve weight dtype).
    gamma32 = gamma.astype(jnp.float32)
    beta32 = beta.astype(jnp.float32)
    w1_32 = w1.astype(jnp.float32)
    w1_eff = (w1_32 * gamma32[:, None]).astype(w1.dtype)
    b1_eff = (beta32 @ w1_32 + b1.astype(jnp.float32)).reshape(1, hidden)   # f32
    b2_eff = b2.astype(jnp.float32).reshape(1, c)                           # f32

    # VMEM budget/step: 2x double-buffered (tm,c) in+out + 2x(w1+w2) weights +
    # (tm,hidden) f32 intermediate; fits well inside the per-generation limits
    # below for tm <= 2048 and TTST-sized c.
    # TODO(synk): for real TTST dims where c is not a multiple of 128 (e.g. 180)
    # pad c / w2's N dim to the next 128 multiple at model-build time so the
    # output store is lane-dense (unmasked vst).
    out = pl.pallas_call(
        _ln_mlp_residual_kernel,
        out_shape=jax.ShapeDtypeStruct((rows, c), x_tokens.dtype),
        grid=grid,
        in_specs=[
            pl.BlockSpec((tm, c), lambda i: (i, 0)),
            # TODO(synk): pipeline_mode=pl.Buffered(1) on the constant blocks
            # would halve their resident VMEM on v7x.
            pl.BlockSpec((c, hidden), lambda i: (0, 0)),
            pl.BlockSpec((1, hidden), lambda i: (0, 0)),
            pl.BlockSpec((hidden, c), lambda i: (0, 0)),
            pl.BlockSpec((1, c), lambda i: (0, 0)),
        ],
        out_specs=pl.BlockSpec((tm, c), lambda i: (i, 0)),
        compiler_params=pltpu.CompilerParams(
            dimension_semantics=("parallel",),
            vmem_limit_bytes=gp["vmem_limit"],
        ),
    )(x2, w1_eff, b1_eff, w2, b2_eff)
    return out.reshape(b, n, c)


if __name__ == "__main__":
    key = jax.random.PRNGKey(0)
    ks = jax.random.split(key, 10)

    b, c, h, w = 2, 4, 16, 16
    hw = h * w
    hidden = int(c * 4.0)                 # mlp_ratio = 4.0

    # --- Kernel A: fused channel LayerNorm + TTSA qkv 1x1 conv -------------
    x_nchw = jax.random.normal(ks[0], (b, c, h, w), jnp.float32)
    g1 = 1.0 + 0.1 * jax.random.normal(ks[1], (c,), jnp.float32)
    be1 = 0.1 * jax.random.normal(ks[2], (c,), jnp.float32)
    w_qkv = 0.2 * jax.random.normal(ks[3], (3 * c, c), jnp.float32)
    b_qkv = 0.1 * jax.random.normal(ks[4], (3 * c,), jnp.float32)

    qkv = jax.block_until_ready(
        channel_layernorm_qkv(x_nchw, g1, be1, w_qkv, b_qkv))

    mu = jnp.mean(x_nchw, axis=1, keepdims=True)
    var = jnp.mean((x_nchw - mu) ** 2, axis=1, keepdims=True)
    ln = (x_nchw - mu) / jnp.sqrt(var + 1e-5) * g1[None, :, None, None] \
        + be1[None, :, None, None]
    ref_qkv = jnp.einsum("oc,bchw->bohw", w_qkv, ln) + b_qkv[None, :, None, None]
    assert qkv.shape == (b, 3 * c, h, w)
    assert float(jnp.max(jnp.abs(qkv - ref_qkv))) < 2e-3

    # --- Kernel B: fused norm2 + Mlp + residual on (b, h*w, c) tokens ------
    x_tok = jax.random.normal(ks[5], (b, hw, c), jnp.float32)
    gamma = 1.0 + 0.1 * jax.random.normal(ks[6], (c,), jnp.float32)
    beta = 0.1 * jax.random.normal(ks[7], (c,), jnp.float32)
    w1 = 0.1 * jax.random.normal(ks[8], (c, hidden), jnp.float32)
    b1 = 0.05 * jnp.ones((hidden,), jnp.float32)
    w2 = 0.1 * jax.random.normal(ks[9], (hidden, c), jnp.float32)
    b2 = 0.05 * jnp.ones((c,), jnp.float32)

    out_mlp = jax.block_until_ready(
        fused_layernorm_mlp(x_tok, gamma, beta, w1, b1, w2, b2))

    mu_t = jnp.mean(x_tok, axis=-1, keepdims=True)
    var_t = jnp.mean((x_tok - mu_t) ** 2, axis=-1, keepdims=True)
    ln_t = (x_tok - mu_t) / jnp.sqrt(var_t + 1e-5) * gamma + beta
    ref_mlp = x_tok + (_gelu_tanh(ln_t @ w1 + b1) @ w2 + b2)
    assert out_mlp.shape == x_tok.shape
    assert float(jnp.max(jnp.abs(out_mlp - ref_mlp))) < 2e-3

    # --- bf16 smoke test of the native-MXU (no f32 up-cast) matmul path ----
    xb = x_tok.astype(jnp.bfloat16)
    out_bf = jax.block_until_ready(
        fused_layernorm_mlp(xb, gamma, beta,
                            w1.astype(jnp.bfloat16), b1,
                            w2.astype(jnp.bfloat16), b2))
    xb32 = xb.astype(jnp.float32)
    mu_b = jnp.mean(xb32, axis=-1, keepdims=True)
    var_b = jnp.mean((xb32 - mu_b) ** 2, axis=-1, keepdims=True)
    ln_b = (xb32 - mu_b) / jnp.sqrt(var_b + 1e-5) * gamma + beta
    ref_bf = xb32 + (_gelu_tanh(ln_b @ w1 + b1) @ w2 + b2)
    assert float(jnp.max(jnp.abs(out_bf.astype(jnp.float32) - ref_bf))) < 1e-1

    print("KERNEL_OK")
</pallas_src>

<mosaic_0001>
module attributes {stable_mosaic.version = 11 : i64} {
  func.func @_chan_ln_qkv_kernel(%arg0: i32, %arg1: i32, %arg2: memref<1x4x256xf32, #tpu.memory_space<vmem>>, %arg3: memref<12x4xf32, #tpu.memory_space<vmem>>, %arg4: memref<12x1xf32, #tpu.memory_space<vmem>>, %arg5: memref<1x12x256xf32, #tpu.memory_space<vmem>>) attributes {dimension_semantics = [#tpu.dimension_semantics<parallel>, #tpu.dimension_semantics<parallel>], iteration_bounds = array<i64: 2, 1>, scalar_prefetch = 0 : i64, scratch_operands = 0 : i64, tpu.core_type = #tpu.core_type<tc>, window_params = [{transform_indices = @transform_0, window_bounds = array<i64: 1, 4, 256>}, {pipeline_mode = #tpu.pipeline_mode<synchronous>, transform_indices = @transform_1, window_bounds = array<i64: 12, 4>}, {pipeline_mode = #tpu.pipeline_mode<synchronous>, transform_indices = @transform_2, window_bounds = array<i64: 12, 1>}, {transform_indices = @transform_3, window_bounds = array<i64: 1, 12, 256>}]} {
    %c0 = arith.constant 0 : index
    %c0_0 = arith.constant 0 : index
    %c0_1 = arith.constant 0 : index
    %0 = vector.load %arg2[%c0, %c0_0, %c0_1] : memref<1x4x256xf32, #tpu.memory_space<vmem>>, vector<1x4x256xf32>
    %1 = vector.shape_cast %0 : vector<1x4x256xf32> to vector<4x256xf32>
    %cst = arith.constant dense<0.000000e+00> : vector<256xf32>
    %2 = vector.multi_reduction <add>, %1, %cst [0] : vector<4x256xf32> to vector<256xf32>
    %3 = vector.shape_cast %2 : vector<256xf32> to vector<1x256xf32>
    %cst_2 = arith.constant 2.500000e-01 : f32
    %4 = vector.broadcast %cst_2 : f32 to vector<1x256xf32>
    %5 = arith.mulf %3, %4 : vector<1x256xf32>
    %6 = arith.mulf %1, %1 : vector<4x256xf32>
    %cst_3 = arith.constant dense<0.000000e+00> : vector<256xf32>
    %7 = vector.multi_reduction <add>, %6, %cst_3 [0] : vector<4x256xf32> to vector<256xf32>
    %8 = vector.shape_cast %7 : vector<256xf32> to vector<1x256xf32>
    %cst_4 = arith.constant 2.500000e-01 : f32
    %9 = vector.broadcast %cst_4 : f32 to vector<1x256xf32>
    %10 = arith.mulf %8, %9 : vector<1x256xf32>
    %11 = arith.mulf %5, %5 : vector<1x256xf32>
    %12 = arith.subf %10, %11 : vector<1x256xf32>
    %cst_5 = arith.constant 9.99999974E-6 : f32
    %13 = vector.broadcast %cst_5 : f32 to vector<1x256xf32>
    %14 = arith.addf %12, %13 : vector<1x256xf32>
    %15 = math.rsqrt %14 : vector<1x256xf32>
    %16 = vector.broadcast %5 : vector<1x256xf32> to vector<4x256xf32>
    %17 = arith.subf %1, %16 : vector<4x256xf32>
    %18 = vector.broadcast %15 : vector<1x256xf32> to vector<4x256xf32>
    %19 = arith.mulf %17, %18 : vector<4x256xf32>
    %c0_6 = arith.constant 0 : index
    %c0_7 = arith.constant 0 : index
    %20 = vector.load %arg3[%c0_6, %c0_7] : memref<12x4xf32, #tpu.memory_space<vmem>>, vector<12x4xf32>
    %cst_8 = arith.constant dense<0.000000e+00> : vector<12x256xf32>
    %21 = tpu.matmul %20, %19, %cst_8 {dimension_numbers = #tpu.dot_dimension_numbers<[1], [0], [0], [1], [0, 0, 1, 1], [], []>} : vector<12x4xf32>, vector<4x256xf32>, vector<12x256xf32> -> vector<12x256xf32>
    %c0_9 = arith.constant 0 : index
    %c0_10 = arith.constant 0 : index
    %22 = vector.load %arg4[%c0_9, %c0_10] : memref<12x1xf32, #tpu.memory_space<vmem>>, vector<12x1xf32>
    %23 = vector.broadcast %22 : vector<12x1xf32> to vector<12x256xf32>
    %24 = arith.addf %21, %23 : vector<12x256xf32>
    %c0_11 = arith.constant 0 : index
    %c0_12 = arith.constant 0 : index
    %c0_13 = arith.constant 0 : index
    %25 = vector.load %arg5[%c0_11, %c0_12, %c0_13] : memref<1x12x256xf32, #tpu.memory_space<vmem>>, vector<1x12x256xf32>
    %26 = vector.shape_cast %25 : vector<1x12x256xf32> to vector<12x256xf32>
    %27 = vector.shape_cast %24 : vector<12x256xf32> to vector<1x12x256xf32>
    tpu.vector_store %arg5[%c0_11, %c0_12, %c0_13], %27 {strides = array<i32>} : memref<1x12x256xf32, #tpu.memory_space<vmem>>, vector<1x12x256xf32>,
    return
  }
  func.func @transform_0(%arg0: i32, %arg1: i32) -> (i32, i32, i32) {
    %c0_i32 = arith.constant 0 : i32
    %c0_i32_0 = arith.constant 0 : i32
    return %arg0, %c0_i32, %arg1 : i32, i32, i32
  }
  func.func @transform_1(%arg0: i32, %arg1: i32) -> (i32, i32) {
    %c0_i32 = arith.constant 0 : i32
    %c0_i32_0 = arith.constant 0 : i32
    %c0_i32_1 = arith.constant 0 : i32
    return %c0_i32, %c0_i32_0 : i32, i32
  }
  func.func @transform_2(%arg0: i32, %arg1: i32) -> (i32, i32) {
    %c0_i32 = arith.constant 0 : i32
    %c0_i32_0 = arith.constant 0 : i32
    %c0_i32_1 = arith.constant 0 : i32
    return %c0_i32, %c0_i32_0 : i32, i32
  }
  func.func @transform_3(%arg0: i32, %arg1: i32) -> (i32, i32, i32) {
    %c0_i32 = arith.constant 0 : i32
    %c0_i32_0 = arith.constant 0 : i32
    return %arg0, %c0_i32, %arg1 : i32, i32, i32
  }
}

</mosaic_0001>

<bundles_post_ra>
// kernel: tpu_custom_call.1
= control target key start
LH: loop header
LB: loop body
LE: loop exit
PB: predicated region body
PF: predicated region fallthrough
CT: control target
= control target key end

     0   :  { %s561_s12 = smov 0   ;;  %s563_s13 = smov 0   ;;  %s618_s0 = inlined_call_operand.vmem [shape: f32[2,4,256], index: 0, kind: input, shape index: {}]   ;;  %s619_s1 = inlined_call_operand.vmem [shape: f32[12,4], index: 1, kind: input, shape index: {}]   ;;  %s620_s2 = inlined_call_operand.vmem [shape: f32[12,1], index: 2, kind: input, shape index: {}]   ;;  %s621_s3 = inlined_call_operand.vmem [shape: f32[2,12,256], index: 3, kind: output, shape index: {}]  }
   0x1   :  { %s565_s14 = smov 0  }
   0x2 LB: > { %s25_s15 = sadd.s32 1, %s533_s13  ;;  %p468_p0 = scmp.ge.s32.totalorder %s537_s14, 1  ;;  %s537_s14 = sphi %s565_s14, %s13_s14   ;;  %s533_s13 = sphi %s563_s13, %s623_s13   ;;  %s529_s12 = sphi %s561_s12, %s622_s12  }
   0x3   : > { %p27_p1 = scmp.ge.s32.totalorder %s25_s15, 2  ;;  %p158_p2 = scmp.lt.s32.totalorder %s537_s14, 3 }
   0x5   : > { %s625_s15 = smov (%p27_p1, %s25_s15), 0  ;;  %p159_p3 = pnand %p468_p0, %p158_p2 }
   0x6   : > { %p191_p4 = scmp.lt.s32.totalorder (!%p159_p3), %s529_s12, 1 }
   0x7   : > { %162 = sbr.rel (%p159_p3) target bundleno = 259 (0x103), region = 32 }
   0xc   : > { %v539_v0 = vmov 0.0   ;;  %v271_v1 = vld [vmem:[%s620_s2] sm:$0xff]  ;;  %s627_s12 = smov (!%p191_p4, %s529_s12), 1  ;;  %v540_v2 = vmov 0   ;;  %vm214_vm0 = vcmask 1043456   ;;  %vm285_vm1 = vcmask 31744  }
   0xd   : > { %360 = vmatprep.mubr.f32.mxu0 %v539_v0  ;;  %366 = vmatprep.mubr.f32.mxu1 %v539_v0  ;;  %s479_s18 = sshll.u32 %s627_s12, 3  ;;  %v272_v3 = vld [vmem:[%s620_s2 + $0x8] sm:$0xf]  ;;  %v269_v53 = vld [vmem:[%s619_s1] sm:$0xff]  ;;  %s480_s28 = sshll.u32 %s627_s12, 5 }
   0xe   : > { %509 = vset.pattern.permute.xlu0 %v540_v2  ;;  %s198_s23 = scalar_lea.vmem %s618_s0, %s479_s18  ;;  %v270_v54 = vld [vmem:[%s619_s1 + $0x8] sm:$0xf]  ;;  %s208_s4 = scalar_lea.vmem %s621_s3, %s480_s28 }
   0xf   : > { %275 = vperm.xlu0 %509, %v271_v1   ;;  %v210_v4 = vld [vmem:[%s198_s23] sm:$0xff] }
  0x10   : > { %v212_v5 = vcombine.high %v210_v4, %v210_v4  ;;  %v215_v6 = vsel %vm214_vm0, %v210_v4, 0.0  ;;  %v231_v7 = vmul.f32 %v210_v4, %v210_v4 }
  0x11   : > { %v216_v8 = vrot.slane %v215_v6, 4 }
  0x12   : > { %v222_v9 = vsel %vm214_vm0, %v212_v5, 0.0  ;;  %v233_v10 = vcombine.high %v231_v7, %v231_v7  ;;  %v235_v11 = vsel %vm214_vm0, %v231_v7, 0.0 }
  0x13   : > { %280 = vperm.xlu0 %509, %v272_v3   ;;  %v217_v12 = vadd.f32 %v216_v8, %v215_v6  ;;  %v223_v13 = vrot.slane %v222_v9, 4  ;;  %v236_v14 = vrot.slane %v235_v11, 4 }
  0x14   : > { %v242_v15 = vsel %vm214_vm0, %v233_v10, 0.0 }
  0x15   : > { %v218_v16 = vrot.slane %v217_v12, 2  ;;  %v224_v17 = vadd.f32 %v223_v13, %v222_v9  ;;  %v237_v18 = vadd.f32 %v236_v14, %v235_v11  ;;  %v243_v19 = vrot.slane %v242_v15, 4 }
  0x17   : > { %v219_v20 = vadd.f32 %v218_v16, %v217_v12  ;;  %v225_v21 = vrot.slane %v224_v17, 2  ;;  %v238_v22 = vrot.slane %v237_v18, 2  ;;  %v244_v23 = vadd.f32 %v243_v19, %v242_v15 }
  0x19   : > { %v220_v24 = vrot.slane %v219_v20, 1  ;;  %v226_v25 = vadd.f32 %v225_v21, %v224_v17  ;;  %v239_v26 = vadd.f32 %v238_v22, %v237_v18  ;;  %v245_v27 = vrot.slane %v244_v23, 2 }
  0x1b   : > { %v221_v28 = vadd.f32 %v220_v24, %v219_v20  ;;  %v227_v29 = vrot.slane %v226_v25, 1  ;;  %v240_v30 = vrot.slane %v239_v26, 1  ;;  %v246_v31 = vadd.f32 %v245_v27, %v244_v23 }
  0x1d   : > { %v228_v32 = vadd.f32 %v227_v29, %v226_v25  ;;  %v229_v33 = vmul.f32 0.25, %v221_v28  ;;  %v241_v34 = vadd.f32 %v240_v30, %v239_v26  ;;  %v247_v35 = vrot.slane %v246_v31, 1 }
  0x1f   : > { %v230_v36 = vmul.f32 0.25, %v228_v32  ;;  %v248_v37 = vadd.f32 %v247_v35, %v246_v31  ;;  %v249_v38 = vmul.f32 0.25, %v241_v34  ;;  %v251_v39 = vmul.f32 %v229_v33, %v229_v33 }
  0x21   : > { %v250_v40 = vmul.f32 0.25, %v248_v37  ;;  %v252_v41 = vmul.f32 %v230_v36, %v230_v36  ;;  %v253_v42 = vsub.f32 %v249_v38, %v251_v39  ;;  %v261_v46 = vcombine.low %v229_v33, %v230_v36 }
  0x23   : > { %v254_v43 = vsub.f32 %v250_v40, %v252_v41  ;;  %v255_v44 = vadd.f32 1e-05, %v253_v42  ;;  %v263_v48 = vsub.f32 %v210_v4, %v261_v46 }
  0x25   : > { %v256_v45 = vadd.f32 1e-05, %v254_v43  ;;  %511 = vrsqrt.f32 %v255_v44 }
  0x27   : > { %513 = vrsqrt.f32 %v256_v45 }
  0x32   : > { %v512_v47 = vpop.eup %511 }
  0x34   : > { %v514_v49 = vpop.eup %513 }
  0x35   : > { %v266_v50 = vcombine.low %v512_v47, %v514_v49 }
  0x37   : > { %v268_v51 = vmul.f32 %v266_v50, %v263_v48 }
  0x39   : > { %v284_v52 = vcombine.high %v268_v51, %v268_v51 }
  0x3b   : > { %473 = vmatprep.subr.msk.mxu0 %vm214_vm0, %v284_v52  ;;  %481 = vmatprep.subr.msk.mxu1 %vm214_vm0, %v284_v52 }
  0x3c   : > { %474 = vmatpush1.msk.msra.mxu0 %vm214_vm0, %v268_v51  ;;  %482 = vmatpush1.msk.msra.mxu1 %vm214_vm0, %v268_v51 }
  0x3d   : > { %475 = vmatmul.mubr.msk.f32.vlgmr.msra.gmra.mxu0 %vm285_vm1, %v269_v53  ;;  %476 = vmatmul.mubr.msk.f32.vlgmr.msra.gmra.mxu1 %vm285_vm1, %v270_v54 }
  0x8a   : > { %v276_v55 = vpop.permute.xlu0 %275 }
  0x8e   : > { %v281_v56 = vpop.permute.xlu0 %280 }
  0xfd   : > { %v362_v57 = vpop.f32.mrf.mxu0  ;;  %v368_v58 = vpop.f32.mrf.mxu1 }
  0xfe   : > { %v363_v59 = vadd.f32 %v362_v57, %v276_v55  ;;  %v369_v60 = vadd.f32 %v368_v58, %v281_v56 }
  0xff   : > { %v364_v61 = vpop.f32.mrf.mxu0  ;;  %v370_v62 = vpop.f32.mrf.mxu1 }
 0x100   : > { %373 = vst [vmem:[%s208_s4] sm:$0xff] %v363_v59  ;;  %375 = vst [vmem:[%s208_s4 + $0x10] sm:$0xf] %v369_v60  ;;  %v365_v63 = vadd.f32 %v364_v61, %v276_v55  ;;  %v371_v0 = vadd.f32 %v370_v62, %v281_v56 }
 0x102   : > { %374 = vst [vmem:[%s208_s4 + $0x8] sm:$0xff] %v365_v63  ;;  %376 = vst [vmem:[%s208_s4 + $0x18] sm:$0xf] %v371_v0 }
 0x103 PF: > { %s13_s14 = sadd.s32 1, %s537_s14   ;;  %s622_s12 = smov %s533_s13 }
 0x104   : > { %p10_p5 = scmp.ge.s32.totalorder %s13_s14, 4   ;;  %s623_s13 = smov %s625_s15 }
 0x106   :  { %12 = sbr.rel (!%p10_p5) target bundleno = 2 (0x2), region = 62 }

</bundles_post_ra>
